<compile_context>
chip_gen: v5e
topology: v5e:2x2
jax: 0.10.0
libtpu: 0.0.40
codegen_flags: <defaults>
</compile_context>

<pallas_src>
import jax
import jax.numpy as jnp
from jax.experimental import pallas as pl
from jax.experimental.pallas import tpu as pltpu

HIDDEN = 128
LANE = 128             # feature dims packed / padded to this lane width
SMALL_BATCH_MAX = 1024  # rows: above this, switch to the gridded throughput path
TB = 2048               # batch-tile rows for the gridded path (~2.4 MiB/step VMEM)


def actor_mlp_kernel(x_ref, w_ref, b_ref, mean_ref):
    # x_ref   : [Bt, in_dim]     unpadded input block (in_dim <= 128, static)
    # w_ref   : [3, 128, 128]    packed (fc1, fc2, action_mean); f32 (latency
    #                            path) or bf16 (throughput path)
    # b_ref   : [3, 128]         packed biases (f32)
    # mean_ref: [Bt, 128]        lane-dense output (real columns: [:out_dim])
    cdt = w_ref.dtype            # MXU input dtype; accumulation is always f32
    in_dim = x_ref.shape[1]      # trace-time constant

    # fc1 + relu: slice the packed fc1 weight to its real [in_dim, 128] rows
    # (static slice, no host-side padding of x needed).
    x = x_ref[...].astype(cdt)
    h1 = jnp.dot(x, w_ref[0, :in_dim, :], preferred_element_type=jnp.float32)
    h1 = jnp.maximum(h1 + b_ref[0:1, :], 0.0)

    # fc2 + relu
    h2 = jnp.dot(h1.astype(cdt), w_ref[1], preferred_element_type=jnp.float32)
    h2 = jnp.maximum(h2 + b_ref[1:2, :], 0.0)

    # action_mean head (128-lane padded output -> unmasked stores)
    mean = jnp.dot(h2.astype(cdt), w_ref[2], preferred_element_type=jnp.float32)
    mean_ref[...] = (mean + b_ref[2:3, :]).astype(mean_ref.dtype)
    # NOTE: bias folding into the matmul / pre-broadcast bias loads were judged
    # negligible here (VPU adds are not the bottleneck on either path).


@jax.jit
def actor_forward(x, packed_params):
    """x: [B, input_dim] float32. Returns (mean, sigma), each [B, out_dim]."""
    w_f32, w_bf16, b_packed, sigma = packed_params  # sigma = exp(sigma_log), [1, out_dim]
    B, in_dim = x.shape
    out_dim = sigma.shape[1]

    if B <= SMALL_BATCH_MAX:
        # Latency path: single gridless invocation, everything VMEM-resident,
        # exact f32 compute, x passed unpadded. Resident VMEM < 1 MiB, well
        # under the scoped limit on every generation (v5e 16 / v6e 32 / v7x 32
        # of 64 MiB), so no vmem_limit_bytes override is needed.
        mean_pad = pl.pallas_call(
            actor_mlp_kernel,
            out_shape=jax.ShapeDtypeStruct((B, LANE), jnp.float32),
            in_specs=[
                pl.BlockSpec(memory_space=pltpu.VMEM),  # x
                pl.BlockSpec(memory_space=pltpu.VMEM),  # packed weights (f32)
                pl.BlockSpec(memory_space=pltpu.VMEM),  # packed biases
            ],
            out_specs=pl.BlockSpec(memory_space=pltpu.VMEM),
        )(x, w_f32, b_packed)
    else:
        # Throughput path: grid over the batch; weights/biases pinned (constant
        # block index -> DMA'd once), (TB, .) activation blocks double-buffered
        # by the pipeline, batch axis "parallel" for v7x's 2 TensorCores, bf16
        # MXU inputs with f32 accumulation (HBM-bandwidth-bound kernel).
        B_pad = ((B + TB - 1) // TB) * TB
        x_p = x if B_pad == B else jnp.pad(x, ((0, B_pad - B), (0, 0)))
        mean_pad = pl.pallas_call(
            actor_mlp_kernel,
            out_shape=jax.ShapeDtypeStruct((B_pad, LANE), jnp.float32),
            grid=(B_pad // TB,),
            in_specs=[
                pl.BlockSpec((TB, in_dim), lambda i: (i, 0)),      # x block
                pl.BlockSpec((3, LANE, LANE), lambda i: (0, 0, 0)),  # weights pinned
                pl.BlockSpec((3, LANE), lambda i: (0, 0)),           # biases pinned
            ],
            out_specs=pl.BlockSpec((TB, LANE), lambda i: (i, 0)),
            compiler_params=pltpu.CompilerParams(
                dimension_semantics=("parallel",)),
        )(x_p, w_bf16, b_packed)

    # Kernel output is lane-dense (128 cols); slice to the real head width here.
    mean = mean_pad[:B, :out_dim]
    # NOTE: consumers that only need the per-action std can read the packed
    # sigma ([1, out_dim]) directly; the broadcast is kept for parity with the
    # PyTorch module's `sigma_log.expand_as(mean)`.
    sigma_b = jnp.broadcast_to(sigma, (B, out_dim))
    return mean, sigma_b


def init_params(key, input_dim, out_dim):
    """Deterministic synthetic init (PyTorch-Linear-like uniform fan_in)."""
    ks = jax.random.split(key, 6)

    def lin(kw, kb, fan_in, fan_out):
        bound = 1.0 / jnp.sqrt(fan_in)
        w = jax.random.uniform(kw, (fan_in, fan_out), jnp.float32, -bound, bound)
        b = jax.random.uniform(kb, (1, fan_out), jnp.float32, -bound, bound)
        return w, b

    w1, b1 = lin(ks[0], ks[1], input_dim, HIDDEN)
    w2, b2 = lin(ks[2], ks[3], HIDDEN, HIDDEN)
    w3, b3 = lin(ks[4], ks[5], HIDDEN, out_dim)
    sigma_log = jnp.zeros((1, out_dim), jnp.float32)  # nn.Parameter(torch.zeros(1, out_dim))
    return (w1, b1, w2, b2, w3, b3, sigma_log)


def pack_params(params):
    """One-time packing: fuse weights/biases into padded buffers, hoist exp().

    NOTE(correctness): sigma = exp(sigma_log) is hoisted here because it is
    input-independent. pack_params must be re-run after every optimizer update
    to sigma_log (or any weight); cached packed params go stale otherwise.
    """
    w1, b1, w2, b2, w3, b3, sigma_log = params
    in_dim = w1.shape[0]
    out_dim = w3.shape[1]
    # TODO(synk): tile the K/N dims for input_dim or out_dim > 128.
    assert in_dim <= LANE and out_dim <= LANE

    w_f32 = jnp.zeros((3, LANE, LANE), jnp.float32)
    w_f32 = w_f32.at[0, :in_dim, :HIDDEN].set(w1)
    w_f32 = w_f32.at[1, :HIDDEN, :HIDDEN].set(w2)
    w_f32 = w_f32.at[2, :HIDDEN, :out_dim].set(w3)
    w_bf16 = w_f32.astype(jnp.bfloat16)  # for the bandwidth-bound gridded path

    b_packed = jnp.zeros((3, LANE), jnp.float32)
    b_packed = b_packed.at[0, :HIDDEN].set(b1[0])
    b_packed = b_packed.at[1, :HIDDEN].set(b2[0])
    b_packed = b_packed.at[2, :out_dim].set(b3[0])

    sigma = jnp.exp(sigma_log)  # input-independent: compute once here
    return (w_f32, w_bf16, b_packed, sigma)


def actor_forward_ref(x, params):
    w1, b1, w2, b2, w3, b3, sigma_log = params
    h1 = jnp.maximum(x @ w1 + b1, 0.0)
    h2 = jnp.maximum(h1 @ w2 + b2, 0.0)
    mean = h2 @ w3 + b3
    sigma = jnp.exp(jnp.broadcast_to(sigma_log, mean.shape))
    return mean, sigma


if __name__ == "__main__":
    key = jax.random.PRNGKey(0)
    k_param, k_x1, k_x2 = jax.random.split(key, 3)

    input_dim, out_dim = 16, 4
    params = init_params(k_param, input_dim, out_dim)
    packed = pack_params(params)

    # --- Latency path: batch=2, gridless, exact f32 -------------------------
    x_small = jax.random.normal(k_x1, (2, input_dim), jnp.float32)
    mean_s, sigma_s = actor_forward(x_small, packed)
    jax.block_until_ready((mean_s, sigma_s))
    mean_sr, sigma_sr = actor_forward_ref(x_small, params)
    assert mean_s.shape == (2, out_dim) and sigma_s.shape == (2, out_dim)
    assert jnp.allclose(mean_s, mean_sr, atol=1e-5, rtol=1e-5)
    assert jnp.allclose(sigma_s, sigma_sr, atol=1e-5, rtol=1e-5)

    # --- Throughput path: batch=2500 -> gridded (TB=2048), bf16 MXU inputs ---
    x_big = jax.random.normal(k_x2, (2500, input_dim), jnp.float32)
    mean_b, sigma_b = actor_forward(x_big, packed)
    jax.block_until_ready((mean_b, sigma_b))
    mean_br, sigma_br = actor_forward_ref(x_big, params)
    assert mean_b.shape == (2500, out_dim) and sigma_b.shape == (2500, out_dim)
    # bf16 MXU inputs (f32 accumulation) -> relaxed tolerance vs. f32 reference.
    assert jnp.allclose(mean_b, mean_br, atol=5e-2, rtol=5e-2)
    assert jnp.allclose(sigma_b, sigma_br, atol=1e-5, rtol=1e-5)

    print("KERNEL_OK")
</pallas_src>

<mosaic_0001>
module attributes {stable_mosaic.version = 11 : i64} {
  func.func @actor_mlp_kernel(%arg0: memref<2x16xf32, #tpu.memory_space<vmem>>, %arg1: memref<3x128x128xf32, #tpu.memory_space<vmem>>, %arg2: memref<3x128xf32, #tpu.memory_space<vmem>>, %arg3: memref<2x128xf32, #tpu.memory_space<vmem>>) attributes {dimension_semantics = [], scalar_prefetch = 0 : i64, scratch_operands = 0 : i64, tpu.core_type = #tpu.core_type<tc>} {
    %c0 = arith.constant 0 : index
    %c0_0 = arith.constant 0 : index
    %0 = vector.load %arg0[%c0, %c0_0] : memref<2x16xf32, #tpu.memory_space<vmem>>, vector<2x16xf32>
    %c0_1 = arith.constant 0 : index
    %c0_2 = arith.constant 0 : index
    %c0_3 = arith.constant 0 : index
    %1 = vector.load %arg1[%c0_1, %c0_2, %c0_3] : memref<3x128x128xf32, #tpu.memory_space<vmem>>, vector<1x16x128xf32>
    %2 = vector.shape_cast %1 : vector<1x16x128xf32> to vector<16x128xf32>
    %cst = arith.constant dense<0.000000e+00> : vector<2x128xf32>
    %3 = tpu.matmul %0, %2, %cst {dimension_numbers = #tpu.dot_dimension_numbers<[1], [0], [0], [1], [0, 0, 1, 1], [], []>} : vector<2x16xf32>, vector<16x128xf32>, vector<2x128xf32> -> vector<2x128xf32>
    %c0_4 = arith.constant 0 : index
    %c0_5 = arith.constant 0 : index
    %4 = vector.load %arg2[%c0_4, %c0_5] : memref<3x128xf32, #tpu.memory_space<vmem>>, vector<1x128xf32>
    %5 = vector.broadcast %4 : vector<1x128xf32> to vector<2x128xf32>
    %6 = arith.addf %3, %5 : vector<2x128xf32>
    %cst_6 = arith.constant 0.000000e+00 : f32
    %7 = vector.broadcast %cst_6 : f32 to vector<2x128xf32>
    %8 = arith.maximumf %6, %7 : vector<2x128xf32>
    %c1 = arith.constant 1 : index
    %c0_7 = arith.constant 0 : index
    %c0_8 = arith.constant 0 : index
    %9 = vector.load %arg1[%c1, %c0_7, %c0_8] : memref<3x128x128xf32, #tpu.memory_space<vmem>>, vector<1x128x128xf32>
    %10 = vector.shape_cast %9 : vector<1x128x128xf32> to vector<128x128xf32>
    %cst_9 = arith.constant dense<0.000000e+00> : vector<2x128xf32>
    %11 = tpu.matmul %8, %10, %cst_9 {dimension_numbers = #tpu.dot_dimension_numbers<[1], [0], [0], [1], [0, 0, 1, 1], [], []>} : vector<2x128xf32>, vector<128x128xf32>, vector<2x128xf32> -> vector<2x128xf32>
    %c1_10 = arith.constant 1 : index
    %c0_11 = arith.constant 0 : index
    %12 = vector.load %arg2[%c1_10, %c0_11] : memref<3x128xf32, #tpu.memory_space<vmem>>, vector<1x128xf32>
    %13 = vector.broadcast %12 : vector<1x128xf32> to vector<2x128xf32>
    %14 = arith.addf %11, %13 : vector<2x128xf32>
    %cst_12 = arith.constant 0.000000e+00 : f32
    %15 = vector.broadcast %cst_12 : f32 to vector<2x128xf32>
    %16 = arith.maximumf %14, %15 : vector<2x128xf32>
    %c2 = arith.constant 2 : index
    %c0_13 = arith.constant 0 : index
    %c0_14 = arith.constant 0 : index
    %17 = vector.load %arg1[%c2, %c0_13, %c0_14] : memref<3x128x128xf32, #tpu.memory_space<vmem>>, vector<1x128x128xf32>
    %18 = vector.shape_cast %17 : vector<1x128x128xf32> to vector<128x128xf32>
    %cst_15 = arith.constant dense<0.000000e+00> : vector<2x128xf32>
    %19 = tpu.matmul %16, %18, %cst_15 {dimension_numbers = #tpu.dot_dimension_numbers<[1], [0], [0], [1], [0, 0, 1, 1], [], []>} : vector<2x128xf32>, vector<128x128xf32>, vector<2x128xf32> -> vector<2x128xf32>
    %c2_16 = arith.constant 2 : index
    %c0_17 = arith.constant 0 : index
    %20 = vector.load %arg2[%c2_16, %c0_17] : memref<3x128xf32, #tpu.memory_space<vmem>>, vector<1x128xf32>
    %21 = vector.broadcast %20 : vector<1x128xf32> to vector<2x128xf32>
    %22 = arith.addf %19, %21 : vector<2x128xf32>
    %c0_18 = arith.constant 0 : index
    %c0_19 = arith.constant 0 : index
    %23 = vector.load %arg3[%c0_18, %c0_19] : memref<2x128xf32, #tpu.memory_space<vmem>>, vector<2x128xf32>
    tpu.vector_store %arg3[%c0_18, %c0_19], %22 {strides = array<i32>} : memref<2x128xf32, #tpu.memory_space<vmem>>, vector<2x128xf32>,
    return
  }
}

</mosaic_0001>

<bundles_post_ra>
// kernel: actor_forward.1
= control target key start
LH: loop header
LB: loop body
LE: loop exit
PB: predicated region body
PF: predicated region fallthrough
CT: control target
= control target key end

     0   :  { %8 = vsyncpa [#allocation3], 0  ;;  %s336_s0 = inlined_call_operand.hbm [shape: f32[2,16], index: 0, kind: input, shape index: {}]   ;;  %s337_s1 = inlined_call_operand.hbm [shape: f32[3,128,128], index: 1, kind: input, shape index: {}]   ;;  %s338_s2 = inlined_call_operand.hbm [shape: f32[3,128], index: 2, kind: input, shape index: {}]   ;;  %s339_s3 = inlined_call_operand.hbm [shape: f32[2,128], index: 3, kind: output, shape index: {}]  }
   0x1   :  { %9 = vsyncpa [#allocation6], 0  ;;  %s26_s14 = sshll.u32 %s337_s1, 4  ;;  %s27_s14 = int_to_ptr.hbm [resolvable:$true] %s26_s14 }
   0x2   :  { %10 = vsyncpa [#allocation4], 0  ;;  %s298_s15 = smov [#allocation5]   ;;  %s16_s19 = sshll.u32 %s336_s0, 4  ;;  %s17_s19 = int_to_ptr.hbm [resolvable:$true] %s16_s19 }
   0x3   :  { %s28_s16 = sshll.u32 %s298_s15, 4  ;;  %s299_s20 = smov 128   ;;  %s29_s16 = int_to_ptr.vmem [resolvable:$true] %s28_s16 }
   0x4   :  { %s300_s21 = smov 8   ;;  %s301_s22 = smov [#allocation2]  }
   0x5   :  { %34 = dma.hbm_to_vmem [thread:$0]  %s27_s14, 6144, %s29_s16, [#allocation6], %s299_s20, %s299_s20, %s300_s21  }
   0x6   :  { %s18_s23 = sshll.u32 %s301_s22, 4  ;;  %s40_s26 = sshll.u32 %s338_s2, 4  ;;  %s19_s23 = int_to_ptr.vmem [resolvable:$true] %s18_s23  ;;  %s41_s26 = int_to_ptr.hbm [resolvable:$true] %s40_s26 }
   0x7   :  { %21 = dma.hbm_to_vmem [thread:$0]  %s17_s19, 32, %s19_s23, [#allocation3]  }
   0x8   :  { %s302_s1 = smov [#allocation7]  }
   0x9   :  { %s42_s27 = sshll.u32 %s302_s1, 4  ;;  %s43_s27 = int_to_ptr.vmem [resolvable:$true] %s42_s27 }
   0xa   :  { %45 = dma.hbm_to_vmem [thread:$0]  %s41_s26, 64, %s43_s27, [#allocation6]  }
   0xb   :  { %292 = dma.done.wait [#allocation3], 32  }
   0xc   :  { %293 = vsyncadd [#allocation3], 4294967264 }
   0xd   :  { %294 = dma.done.wait [#allocation6], 6208  }
   0xe   :  { %295 = vsyncadd [#allocation6], 4294961088  ;;  %v60_v0 = vld [vmem:[#allocation5 + $0x8] sm:$0xff]  ;;  %v59_v1 = vld [vmem:[#allocation5] sm:$0xff]  ;;  %vm63_vm0 = vcmask 130048   ;;  %s303_s0 = smov [#allocation8]  }
   0xf   :  { %81 = vmatpush.msra.mxu0 %v60_v0  ;;  %v58_v2 = vld [vmem:[#allocation2] sm:$0x3]  ;;  %v103_v4 = vld [vmem:[#allocation5 + $0xf0] sm:$0xff]  ;;  %v102_v5 = vld [vmem:[#allocation5 + $0xe8] sm:$0xff]  ;;  %s173_s2 = sshll.u32 %s303_s0, 4  ;;  %s175_s30 = sshll.u32 %s339_s3, 4  ;;  %s174_s2 = int_to_ptr.vmem [resolvable:$true] %s173_s2  ;;  %s176_s30 = int_to_ptr.hbm [resolvable:$true] %s175_s30 }
  0x10   :  { %v104_v3 = vld [vmem:[#allocation5 + $0xf8] sm:$0xff]  ;;  %v101_v6 = vld [vmem:[#allocation5 + $0xe0] sm:$0xff]  ;;  %v99_v8 = vld [vmem:[#allocation5 + $0xd0] sm:$0xff] }
  0x11   :  { %107 = vmatpush.msra.mxu1 %v104_v3  ;;  %82 = vmatpush.msra.mxu0 %v59_v1  ;;  %v100_v7 = vld [vmem:[#allocation5 + $0xd8] sm:$0xff]  ;;  %v98_v9 = vld [vmem:[#allocation5 + $0xc8] sm:$0xff]  ;;  %v97_v10 = vld [vmem:[#allocation5 + $0xc0] sm:$0xff] }
  0x12   :  { %186 = vmatmul.msk.f32.vlgmr.msra.gmra.mxu0 %vm63_vm0, %v58_v2  ;;  %v96_v11 = vld [vmem:[#allocation5 + $0xb8] sm:$0xff]  ;;  %v95_v12 = vld [vmem:[#allocation5 + $0xb0] sm:$0xff]  ;;  %v94_v13 = vld [vmem:[#allocation5 + $0xa8] sm:$0xff] }
  0x13   :  { %108 = vmatpush.msra.mxu1 %v103_v4  ;;  %v93_v14 = vld [vmem:[#allocation5 + $0xa0] sm:$0xff]  ;;  %v92_v15 = vld [vmem:[#allocation5 + $0x98] sm:$0xff]  ;;  %v91_v16 = vld [vmem:[#allocation5 + $0x90] sm:$0xff] }
  0x14   :  { %v90_v17 = vld [vmem:[#allocation5 + $0x88] sm:$0xff]  ;;  %v89_v18 = vld [vmem:[#allocation5 + $0x80] sm:$0xff]  ;;  %v144_v19 = vld [vmem:[#allocation5 + $0x178] sm:$0xff] }
  0x15   :  { %109 = vmatpush.msra.mxu1 %v102_v5  ;;  %v143_v20 = vld [vmem:[#allocation5 + $0x170] sm:$0xff]  ;;  %147 = vmatpush.msra.mxu2 %v144_v19  ;;  %v142_v21 = vld [vmem:[#allocation5 + $0x168] sm:$0xff]  ;;  %v141_v22 = vld [vmem:[#allocation5 + $0x160] sm:$0xff] }
  0x16   :  { %v140_v23 = vld [vmem:[#allocation5 + $0x158] sm:$0xff]  ;;  %v139_v24 = vld [vmem:[#allocation5 + $0x150] sm:$0xff]  ;;  %v138_v25 = vld [vmem:[#allocation5 + $0x148] sm:$0xff] }
  0x17   :  { %110 = vmatpush.msra.mxu1 %v101_v6  ;;  %148 = vmatpush.msra.mxu2 %v143_v20  ;;  %v137_v26 = vld [vmem:[#allocation5 + $0x140] sm:$0xff]  ;;  %v136_v27 = vld [vmem:[#allocation5 + $0x138] sm:$0xff]  ;;  %v135_v28 = vld [vmem:[#allocation5 + $0x130] sm:$0xff] }
  0x18   :  { %v134_v29 = vld [vmem:[#allocation5 + $0x128] sm:$0xff]  ;;  %v133_v30 = vld [vmem:[#allocation5 + $0x120] sm:$0xff]  ;;  %v132_v31 = vld [vmem:[#allocation5 + $0x118] sm:$0xff] }
  0x19   :  { %111 = vmatpush.msra.mxu1 %v100_v7  ;;  %149 = vmatpush.msra.mxu2 %v142_v21  ;;  %v193_v32 = vld [vmem:[#allocation7] ss:$0 sm:$0xff]  ;;  %v131_v36 = vld [vmem:[#allocation5 + $0x110] sm:$0xff]  ;;  %v130_v37 = vld [vmem:[#allocation5 + $0x108] sm:$0xff] }
  0x1a   :  { %v129_v38 = vld [vmem:[#allocation5 + $0x100] sm:$0xff] }
  0x1b   :  { %112 = vmatpush.msra.mxu1 %v99_v8  ;;  %150 = vmatpush.msra.mxu2 %v141_v22  ;;  %v194_v39 = vld [vmem:[#allocation7 + $0x1] ss:$0 sm:$0xff]  ;;  %v195_v43 = vld [vmem:[#allocation7 + $0x2] ss:$0 sm:$0xff] }
  0x1d   :  { %113 = vmatpush.msra.mxu1 %v98_v9  ;;  %151 = vmatpush.msra.mxu2 %v140_v23 }
  0x1f   :  { %114 = vmatpush.msra.mxu1 %v97_v10  ;;  %152 = vmatpush.msra.mxu2 %v139_v24 }
  0x21   :  { %115 = vmatpush.msra.mxu1 %v96_v11  ;;  %153 = vmatpush.msra.mxu2 %v138_v25 }
  0x23   :  { %116 = vmatpush.msra.mxu1 %v95_v12  ;;  %154 = vmatpush.msra.mxu2 %v137_v26 }
  0x25   :  { %117 = vmatpush.msra.mxu1 %v94_v13  ;;  %155 = vmatpush.msra.mxu2 %v136_v27 }
  0x27   :  { %118 = vmatpush.msra.mxu1 %v93_v14  ;;  %156 = vmatpush.msra.mxu2 %v135_v28 }
  0x29   :  { %119 = vmatpush.msra.mxu1 %v92_v15  ;;  %157 = vmatpush.msra.mxu2 %v134_v29 }
  0x2b   :  { %120 = vmatpush.msra.mxu1 %v91_v16  ;;  %158 = vmatpush.msra.mxu2 %v133_v30 }
  0x2d   :  { %121 = vmatpush.msra.mxu1 %v90_v17  ;;  %159 = vmatpush.msra.mxu2 %v132_v31 }
  0x2f   :  { %122 = vmatpush.msra.mxu1 %v89_v18  ;;  %160 = vmatpush.msra.mxu2 %v131_v36 }
  0x31   :  { %161 = vmatpush.msra.mxu2 %v130_v37 }
  0x33   :  { %162 = vmatpush.msra.mxu2 %v129_v38 }
  0x8f   :  { %v84_v33 = vpop.f32.mrf.mxu0 }
  0x90   :  { %v85_v34 = vadd.f32 %v193_v32, %v84_v33 }
  0x92   :  { %v87_v35 = vmax.f32 %v85_v34, 0.0 }
  0x94   :  { %123 = vmatmul.f32.vlgmr.msra.gmra.mxu1 %v87_v35 }
 0x111   :  { %v124_v40 = vpop.f32.mrf.mxu1 }
 0x112   :  { %v125_v41 = vadd.f32 %v194_v39, %v124_v40 }
 0x114   :  { %v127_v42 = vmax.f32 %v125_v41, 0.0 }
 0x116   :  { %163 = vmatmul.f32.vlgmr.msra.gmra.mxu2 %v127_v42 }
 0x199   :  { %v164_v44 = vpop.f32.mrf.mxu2 }
 0x19a   :  { %v165_v45 = vadd.f32 %v195_v43, %v164_v44 }
 0x19c   :  { %167 = vst [vmem:[#allocation8] sm:$0x3] %v165_v45 }
 0x19d   :  { %178 = dma.vmem_to_hbm [thread:$0]  %s174_s2, 32, %s176_s30, [#allocation4]  }
 0x19e   :  { %296 = dma.done.wait [#allocation4], 32  }
 0x19f   :  { %297 = vsyncadd [#allocation4], 4294967264 }
 0x1a0   :  { %183 = vsyncpa [#allocation3], 1 }
 0x1a1   :  { %184 = vsyncpa [#allocation6], 1 }
 0x1a2   :  { %185 = vsyncpa [#allocation4], 1 }

</bundles_post_ra>
